<compile_context>
chip_gen: v5e
topology: v5e:2x2
jax: 0.10.0
libtpu: 0.0.40
codegen_flags: <defaults>
</compile_context>

<pallas_src>
import jax
import jax.numpy as jnp
from jax import lax
from jax.experimental import pallas as pl
from jax.experimental.pallas import tpu as pltpu

# ---- problem sizes (consistent with the module) ------------------------------
N, CIN, H, W = 2, 4, 16, 16
COUT, KH, KW = 8, 3, 3
NCLS = 10
HW = H * W                    # 256
P = KH * KW * CIN             # 36 (real contraction size)

# lane-dense padded sizes
LANE = 128
PPAD = LANE                   # padded conv contraction dim (36 -> 128)
CPAD = LANE                   # padded conv-out / fc-in dim (8 -> 128)
NCLS_PAD = LANE               # padded class dim (10 -> 128)
NPAD = 8                      # padded batch rows for the (8,128) output slab
ROWS = N * HW                 # 512 merged im2col rows

BIAS_COL = P                  # lane 36 of x_cols carries constant 1.0 (conv bias)
ONE_LANE = COUT               # lane 8 of conv output carries constant 1.0 (fc bias)

# flat_param split offsets (PyTorch named_parameters order)
SZ_CONV_W = COUT * CIN * KH * KW        # 288
SZ_CONV_B = COUT                        # 8
SZ_FC_W = NCLS * COUT                   # 80
SZ_FC_B = NCLS                          # 10
PARAM_NUMEL = SZ_CONV_W + SZ_CONV_B + SZ_FC_W + SZ_FC_B   # 386

# packed parameter-slab layout (8-row aligned, 128 lanes wide)
OFF_WCONV = 0                 # rows [0, 128):   conv weight (+bias row 36)
OFF_WFC = PPAD                # rows [128, 256): fc weight   (+bias row 8)
SLAB_ROWS = PPAD + CPAD       # 256


# ---- Pallas kernel: 3 MXU matmuls (conv / avg-pool / fc), biases folded ------
def _reparam_cnn_kernel(xcols_ref, params_ref, pool_ref, out_ref):
    # xcols_ref:  (ROWS, PPAD)        im2col patches; lane 36 == 1.0, lanes 37.. == 0
    # params_ref: (SLAB_ROWS, 128)    packed conv.w(+b) / fc.w(+b)
    # pool_ref:   (NPAD, ROWS)        block-diagonal 1/HW average-pool selector
    # out_ref:    (NPAD, NCLS_PAD)    lane-dense logits slab
    x = xcols_ref[...]                                   # (512, 128)
    w_conv = params_ref[OFF_WCONV:OFF_WCONV + PPAD, :]   # (128, 128)
    w_fc = params_ref[OFF_WFC:OFF_WFC + CPAD, :]         # (128, 128)

    # conv as matmul; bias already folded into row 36; ReLU
    conv = jnp.maximum(
        jnp.dot(x, w_conv, preferred_element_type=jnp.float32), 0.0)   # (512, 128)
    # global average pool over H*W, routed through the MXU (lane 8 stays == 1)
    pooled = jnp.dot(pool_ref[...], conv,
                     preferred_element_type=jnp.float32)                # (8, 128)
    # fc; bias already folded into row 8 (picked up by the constant lane)
    out_ref[...] = jnp.dot(pooled, w_fc,
                           preferred_element_type=jnp.float32)          # (8, 128)


def _pallas_forward(x_cols_pad, param_slab, pool_mat):
    return pl.pallas_call(
        _reparam_cnn_kernel,
        out_shape=jax.ShapeDtypeStruct((NPAD, NCLS_PAD), jnp.float32),
        in_specs=[
            pl.BlockSpec((ROWS, PPAD), lambda: (0, 0)),
            pl.BlockSpec((SLAB_ROWS, LANE), lambda: (0, 0)),
            pl.BlockSpec((NPAD, ROWS), lambda: (0, 0)),
        ],
        out_specs=pl.BlockSpec((NPAD, NCLS_PAD), lambda: (0, 0)),
    )(x_cols_pad, param_slab, pool_mat)


# ---- ReparamModule.forward equivalent (fully jitted) --------------------------
@jax.jit
def reparam_forward(x_nchw, flat_param):
    # torch.squeeze(flat_param)
    flat_param = jnp.squeeze(flat_param)

    # _unflatten_param: split by numel, view into original PyTorch shapes
    o = 0
    w_conv = flat_param[o:o + SZ_CONV_W].reshape(COUT, CIN, KH, KW); o += SZ_CONV_W  # OIHW
    b_conv = flat_param[o:o + SZ_CONV_B]; o += SZ_CONV_B
    w_fc = flat_param[o:o + SZ_FC_W].reshape(NCLS, COUT); o += SZ_FC_W               # (out, in)
    b_fc = flat_param[o:o + SZ_FC_B]; o += SZ_FC_B

    # --- im2col via a single patches op (feature order = channel-major: c,kh,kw)
    patches = lax.conv_general_dilated_patches(
        lhs=x_nchw, filter_shape=(KH, KW), window_strides=(1, 1),
        padding="SAME", dimension_numbers=("NCHW", "OIHW", "NCHW"))      # (N, 36, H, W)
    x_cols = jnp.transpose(patches, (0, 2, 3, 1)).reshape(ROWS, P)       # (512, 36)
    x_cols_pad = jnp.zeros((ROWS, PPAD), jnp.float32)
    x_cols_pad = x_cols_pad.at[:, :P].set(x_cols)
    x_cols_pad = x_cols_pad.at[:, BIAS_COL].set(1.0)                     # conv-bias carrier

    # conv weight OIHW -> (CIN,KH,KW,COUT) rows (matches channel-major patches)
    w_mat = jnp.transpose(w_conv, (1, 2, 3, 0)).reshape(P, COUT)         # (36, 8)
    w_conv_blk = jnp.zeros((PPAD, LANE), jnp.float32)
    w_conv_blk = w_conv_blk.at[:P, :COUT].set(w_mat)
    w_conv_blk = w_conv_blk.at[BIAS_COL, :COUT].set(b_conv)              # conv bias fold
    w_conv_blk = w_conv_blk.at[BIAS_COL, ONE_LANE].set(1.0)              # fc-bias "1" carrier

    # fc weight (out,in) -> (in,out); fc bias folded into row ONE_LANE
    w_fc_blk = jnp.zeros((CPAD, LANE), jnp.float32)
    w_fc_blk = w_fc_blk.at[:COUT, :NCLS].set(w_fc.T)
    w_fc_blk = w_fc_blk.at[ONE_LANE, :NCLS].set(b_fc)                    # fc bias fold

    param_slab = jnp.concatenate([w_conv_blk, w_fc_blk], axis=0)         # (256, 128)

    # block-diagonal 1/HW pool selector (input-independent -> constant-folded by XLA)
    pool_mat = (jnp.arange(ROWS) // HW ==
                jnp.arange(NPAD)[:, None]).astype(jnp.float32) / HW      # (8, 512)

    out = _pallas_forward(x_cols_pad, param_slab, pool_mat)
    # rows >= N and lanes >= NCLS of the slab are pad/carrier values: slice here.
    return out[:N, :NCLS]                                                # (N, NCLS)


# ---- pure-JAX reference (for sanity check only) ------------------------------
def _reference_forward(x_nchw, flat_param):
    flat_param = jnp.squeeze(flat_param)
    o = 0
    w_conv = flat_param[o:o + SZ_CONV_W].reshape(COUT, CIN, KH, KW); o += SZ_CONV_W
    b_conv = flat_param[o:o + SZ_CONV_B]; o += SZ_CONV_B
    w_fc = flat_param[o:o + SZ_FC_W].reshape(NCLS, COUT); o += SZ_FC_W
    b_fc = flat_param[o:o + SZ_FC_B]; o += SZ_FC_B
    conv = jax.lax.conv_general_dilated(
        x_nchw, w_conv, window_strides=(1, 1), padding="SAME",
        dimension_numbers=("NCHW", "OIHW", "NCHW"))
    conv = conv + b_conv[None, :, None, None]
    conv = jnp.maximum(conv, 0.0)
    pooled = conv.mean(axis=(2, 3))                                      # (N, COUT)
    return pooled @ w_fc.T + b_fc


if __name__ == "__main__":
    key = jax.random.PRNGKey(0)
    k_x, k_p = jax.random.split(key)

    # deterministic synthetic input + flat parameter vector (with a leading
    # singleton dim, exercising the torch.squeeze in forward)
    x = jax.random.normal(k_x, (N, CIN, H, W), dtype=jnp.float32)
    flat_param = 0.1 * jax.random.normal(k_p, (1, PARAM_NUMEL), dtype=jnp.float32)

    out = reparam_forward(x, flat_param)
    out = jax.block_until_ready(out)

    ref = _reference_forward(x, flat_param)
    assert out.shape == (N, NCLS)
    assert jnp.allclose(out, ref, atol=1e-4, rtol=1e-4), "mismatch vs reference"

    print("KERNEL_OK")
</pallas_src>

<mosaic_0001>
module attributes {stable_mosaic.version = 11 : i64} {
  func.func @_reparam_cnn_kernel(%arg0: memref<512x128xf32, #tpu.memory_space<vmem>>, %arg1: memref<256x128xf32, #tpu.memory_space<vmem>>, %arg2: memref<8x512xf32, #tpu.memory_space<vmem>>, %arg3: memref<8x128xf32, #tpu.memory_space<vmem>>) attributes {dimension_semantics = [], scalar_prefetch = 0 : i64, scratch_operands = 0 : i64, tpu.core_type = #tpu.core_type<tc>} {
    %c0 = arith.constant 0 : index
    %c0_0 = arith.constant 0 : index
    %0 = vector.load %arg0[%c0, %c0_0] : memref<512x128xf32, #tpu.memory_space<vmem>>, vector<512x128xf32>
    %c0_1 = arith.constant 0 : index
    %c0_2 = arith.constant 0 : index
    %1 = vector.load %arg1[%c0_1, %c0_2] : memref<256x128xf32, #tpu.memory_space<vmem>>, vector<128x128xf32>
    %c128 = arith.constant 128 : index
    %c0_3 = arith.constant 0 : index
    %2 = vector.load %arg1[%c128, %c0_3] : memref<256x128xf32, #tpu.memory_space<vmem>>, vector<128x128xf32>
    %cst = arith.constant dense<0.000000e+00> : vector<512x128xf32>
    %3 = tpu.matmul %0, %1, %cst {dimension_numbers = #tpu.dot_dimension_numbers<[1], [0], [0], [1], [0, 0, 1, 1], [], []>} : vector<512x128xf32>, vector<128x128xf32>, vector<512x128xf32> -> vector<512x128xf32>
    %cst_4 = arith.constant 0.000000e+00 : f32
    %4 = vector.broadcast %cst_4 : f32 to vector<512x128xf32>
    %5 = arith.maximumf %3, %4 : vector<512x128xf32>
    %c0_5 = arith.constant 0 : index
    %c0_6 = arith.constant 0 : index
    %6 = vector.load %arg2[%c0_5, %c0_6] : memref<8x512xf32, #tpu.memory_space<vmem>>, vector<8x512xf32>
    %cst_7 = arith.constant dense<0.000000e+00> : vector<8x128xf32>
    %7 = tpu.matmul %6, %5, %cst_7 {dimension_numbers = #tpu.dot_dimension_numbers<[1], [0], [0], [1], [0, 0, 1, 1], [], []>} : vector<8x512xf32>, vector<512x128xf32>, vector<8x128xf32> -> vector<8x128xf32>
    %cst_8 = arith.constant dense<0.000000e+00> : vector<8x128xf32>
    %8 = tpu.matmul %7, %2, %cst_8 {dimension_numbers = #tpu.dot_dimension_numbers<[1], [0], [0], [1], [0, 0, 1, 1], [], []>} : vector<8x128xf32>, vector<128x128xf32>, vector<8x128xf32> -> vector<8x128xf32>
    %c0_9 = arith.constant 0 : index
    %c0_10 = arith.constant 0 : index
    %9 = vector.load %arg3[%c0_9, %c0_10] : memref<8x128xf32, #tpu.memory_space<vmem>>, vector<8x128xf32>
    tpu.vector_store %arg3[%c0_9, %c0_10], %8 {strides = array<i32>} : memref<8x128xf32, #tpu.memory_space<vmem>>, vector<8x128xf32>,
    return
  }
}

</mosaic_0001>

<bundles_post_ra>
// kernel: reparam_forward.1
= control target key start
LH: loop header
LB: loop body
LE: loop exit
PB: predicated region body
PF: predicated region fallthrough
CT: control target
= control target key end

     0   :  { %s977_s1 = inlined_call_operand.vmem [shape: f32[256,128], index: 1, kind: input, shape index: {}]   ;;  %s978_s0 = inlined_call_operand.vmem [shape: f32[512,128], index: 0, kind: input, shape index: {}]   ;;  %s979_s2 = inlined_call_operand.vmem [shape: f32[8,512], index: 2, kind: input, shape index: {}]   ;;  %s980_s3 = inlined_call_operand.vmem [shape: f32[8,128], index: 3, kind: output, shape index: {}]  }
   0x1   :  { %v93_v0 = vld [vmem:[%s977_s1 + $0x78] sm:$0xff]  ;;  %v92_v1 = vld [vmem:[%s977_s1 + $0x70] sm:$0xff]  ;;  %v91_v2 = vld [vmem:[%s977_s1 + $0x68] sm:$0xff] }
   0x2   :  { %110 = vmatpush.msra.mxu0 %v93_v0  ;;  %492 = vmatpush.msra.mxu1 %v93_v0  ;;  %v90_v3 = vld [vmem:[%s977_s1 + $0x60] sm:$0xff]  ;;  %v89_v4 = vld [vmem:[%s977_s1 + $0x58] sm:$0xff]  ;;  %v88_v5 = vld [vmem:[%s977_s1 + $0x50] sm:$0xff] }
   0x3   :  { %493 = vmatpush.msra.mxu2 %v93_v0  ;;  %494 = vmatpush.msra.mxu3 %v93_v0  ;;  %v87_v6 = vld [vmem:[%s977_s1 + $0x48] sm:$0xff]  ;;  %v86_v7 = vld [vmem:[%s977_s1 + $0x40] sm:$0xff]  ;;  %v85_v8 = vld [vmem:[%s977_s1 + $0x38] sm:$0xff] }
   0x4   :  { %111 = vmatpush.msra.mxu0 %v92_v1  ;;  %495 = vmatpush.msra.mxu1 %v92_v1  ;;  %v84_v9 = vld [vmem:[%s977_s1 + $0x30] sm:$0xff]  ;;  %v83_v10 = vld [vmem:[%s977_s1 + $0x28] sm:$0xff]  ;;  %v82_v11 = vld [vmem:[%s977_s1 + $0x20] sm:$0xff] }
   0x5   :  { %496 = vmatpush.msra.mxu2 %v92_v1  ;;  %497 = vmatpush.msra.mxu3 %v92_v1  ;;  %v81_v12 = vld [vmem:[%s977_s1 + $0x18] sm:$0xff]  ;;  %v80_v13 = vld [vmem:[%s977_s1 + $0x10] sm:$0xff]  ;;  %v79_v14 = vld [vmem:[%s977_s1 + $0x8] sm:$0xff] }
   0x6   :  { %112 = vmatpush.msra.mxu0 %v91_v2  ;;  %498 = vmatpush.msra.mxu1 %v91_v2  ;;  %v78_v15 = vld [vmem:[%s977_s1] sm:$0xff]  ;;  %v33_v17 = vld [vmem:[%s978_s0 + $0x98] sm:$0xff]  ;;  %v47_v18 = vld [vmem:[%s978_s0 + $0x108] sm:$0xff] }
   0x7   :  { %499 = vmatpush.msra.mxu2 %v91_v2  ;;  %500 = vmatpush.msra.mxu3 %v91_v2  ;;  %v14_v16 = vld [vmem:[%s978_s0] sm:$0xff]  ;;  %v60_v19 = vld [vmem:[%s978_s0 + $0x170] sm:$0xff]  ;;  %v15_v20 = vld [vmem:[%s978_s0 + $0x8] sm:$0xff] }
   0x8   :  { %113 = vmatpush.msra.mxu0 %v90_v3  ;;  %501 = vmatpush.msra.mxu1 %v90_v3  ;;  %v34_v21 = vld [vmem:[%s978_s0 + $0xa0] sm:$0xff]  ;;  %v48_v22 = vld [vmem:[%s978_s0 + $0x110] sm:$0xff]  ;;  %v61_v23 = vld [vmem:[%s978_s0 + $0x178] sm:$0xff] }
   0x9   :  { %502 = vmatpush.msra.mxu2 %v90_v3  ;;  %503 = vmatpush.msra.mxu3 %v90_v3  ;;  %v16_v24 = vld [vmem:[%s978_s0 + $0x10] sm:$0xff]  ;;  %v35_v25 = vld [vmem:[%s978_s0 + $0xa8] sm:$0xff]  ;;  %v49_v26 = vld [vmem:[%s978_s0 + $0x118] sm:$0xff] }
   0xa   :  { %114 = vmatpush.msra.mxu0 %v89_v4  ;;  %504 = vmatpush.msra.mxu1 %v89_v4  ;;  %v62_v27 = vld [vmem:[%s978_s0 + $0x180] sm:$0xff]  ;;  %v17_v28 = vld [vmem:[%s978_s0 + $0x18] sm:$0xff]  ;;  %v36_v29 = vld [vmem:[%s978_s0 + $0xb0] sm:$0xff] }
   0xb   :  { %505 = vmatpush.msra.mxu2 %v89_v4  ;;  %506 = vmatpush.msra.mxu3 %v89_v4  ;;  %v50_v30 = vld [vmem:[%s978_s0 + $0x120] sm:$0xff]  ;;  %v63_v31 = vld [vmem:[%s978_s0 + $0x188] sm:$0xff]  ;;  %v37_v33 = vld [vmem:[%s978_s0 + $0xb8] sm:$0xff] }
   0xc   :  { %115 = vmatpush.msra.mxu0 %v88_v5  ;;  %507 = vmatpush.msra.mxu1 %v88_v5  ;;  %v18_v32 = vld [vmem:[%s978_s0 + $0x20] sm:$0xff]  ;;  %v51_v34 = vld [vmem:[%s978_s0 + $0x128] sm:$0xff]  ;;  %v64_v35 = vld [vmem:[%s978_s0 + $0x190] sm:$0xff] }
   0xd   :  { %508 = vmatpush.msra.mxu2 %v88_v5  ;;  %509 = vmatpush.msra.mxu3 %v88_v5  ;;  %v19_v36 = vld [vmem:[%s978_s0 + $0x28] sm:$0xff]  ;;  %v38_v37 = vld [vmem:[%s978_s0 + $0xc0] sm:$0xff]  ;;  %v52_v38 = vld [vmem:[%s978_s0 + $0x130] sm:$0xff] }
   0xe   :  { %116 = vmatpush.msra.mxu0 %v87_v6  ;;  %510 = vmatpush.msra.mxu1 %v87_v6  ;;  %v65_v39 = vld [vmem:[%s978_s0 + $0x198] sm:$0xff]  ;;  %v20_v40 = vld [vmem:[%s978_s0 + $0x30] sm:$0xff]  ;;  %v39_v41 = vld [vmem:[%s978_s0 + $0xc8] sm:$0xff] }
   0xf   :  { %511 = vmatpush.msra.mxu2 %v87_v6  ;;  %512 = vmatpush.msra.mxu3 %v87_v6  ;;  %v53_v42 = vld [vmem:[%s978_s0 + $0x138] sm:$0xff]  ;;  %v66_v43 = vld [vmem:[%s978_s0 + $0x1a0] sm:$0xff]  ;;  %v40_v45 = vld [vmem:[%s978_s0 + $0xd0] sm:$0xff] }
  0x10   :  { %117 = vmatpush.msra.mxu0 %v86_v7  ;;  %513 = vmatpush.msra.mxu1 %v86_v7  ;;  %v21_v44 = vld [vmem:[%s978_s0 + $0x38] sm:$0xff]  ;;  %v54_v46 = vld [vmem:[%s978_s0 + $0x140] sm:$0xff]  ;;  %v67_v47 = vld [vmem:[%s978_s0 + $0x1a8] sm:$0xff] }
  0x11   :  { %514 = vmatpush.msra.mxu2 %v86_v7  ;;  %515 = vmatpush.msra.mxu3 %v86_v7  ;;  %v22_v48 = vld [vmem:[%s978_s0 + $0x40] sm:$0xff]  ;;  %v41_v49 = vld [vmem:[%s978_s0 + $0xd8] sm:$0xff]  ;;  %v55_v50 = vld [vmem:[%s978_s0 + $0x148] sm:$0xff] }
  0x12   :  { %118 = vmatpush.msra.mxu0 %v85_v8  ;;  %516 = vmatpush.msra.mxu1 %v85_v8  ;;  %v68_v51 = vld [vmem:[%s978_s0 + $0x1b0] sm:$0xff]  ;;  %v23_v52 = vld [vmem:[%s978_s0 + $0x48] sm:$0xff]  ;;  %v42_v53 = vld [vmem:[%s978_s0 + $0xe0] sm:$0xff] }
  0x13   :  { %517 = vmatpush.msra.mxu2 %v85_v8  ;;  %518 = vmatpush.msra.mxu3 %v85_v8  ;;  %v56_v54 = vld [vmem:[%s978_s0 + $0x150] sm:$0xff]  ;;  %v69_v55 = vld [vmem:[%s978_s0 + $0x1b8] sm:$0xff]  ;;  %v43_v57 = vld [vmem:[%s978_s0 + $0xe8] sm:$0xff] }
  0x14   :  { %119 = vmatpush.msra.mxu0 %v84_v9  ;;  %519 = vmatpush.msra.mxu1 %v84_v9  ;;  %v24_v56 = vld [vmem:[%s978_s0 + $0x50] sm:$0xff]  ;;  %v57_v58 = vld [vmem:[%s978_s0 + $0x158] sm:$0xff]  ;;  %v70_v59 = vld [vmem:[%s978_s0 + $0x1c0] sm:$0xff] }
  0x15   :  { %520 = vmatpush.msra.mxu2 %v84_v9  ;;  %521 = vmatpush.msra.mxu3 %v84_v9  ;;  %v25_v60 = vld [vmem:[%s978_s0 + $0x58] sm:$0xff]  ;;  %v44_v61 = vld [vmem:[%s978_s0 + $0xf0] sm:$0xff]  ;;  %v58_v62 = vld [vmem:[%s978_s0 + $0x160] sm:$0xff] }
  0x16   :  { %120 = vmatpush.msra.mxu0 %v83_v10  ;;  %522 = vmatpush.msra.mxu1 %v83_v10  ;;  %v71_v63 = vld [vmem:[%s978_s0 + $0x1c8] sm:$0xff]  ;;  %v26_v0 = vld [vmem:[%s978_s0 + $0x60] sm:$0xff]  ;;  %v45_v1 = vld [vmem:[%s978_s0 + $0xf8] sm:$0xff] }
  0x17   :  { %523 = vmatpush.msra.mxu2 %v83_v10  ;;  %524 = vmatpush.msra.mxu3 %v83_v10  ;;  %v59_v2 = vld [vmem:[%s978_s0 + $0x168] sm:$0xff]  ;;  %v72_v3 = vld [vmem:[%s978_s0 + $0x1d0] sm:$0xff]  ;;  %v73_v5 = vld [vmem:[%s978_s0 + $0x1d8] sm:$0xff] }
  0x18   :  { %121 = vmatpush.msra.mxu0 %v82_v11  ;;  %525 = vmatpush.msra.mxu1 %v82_v11  ;;  %v27_v4 = vld [vmem:[%s978_s0 + $0x68] sm:$0xff]  ;;  %v28_v6 = vld [vmem:[%s978_s0 + $0x70] sm:$0xff]  ;;  %v74_v7 = vld [vmem:[%s978_s0 + $0x1e0] sm:$0xff] }
  0x19   :  { %526 = vmatpush.msra.mxu2 %v82_v11  ;;  %527 = vmatpush.msra.mxu3 %v82_v11  ;;  %v29_v8 = vld [vmem:[%s978_s0 + $0x78] sm:$0xff]  ;;  %v75_v9 = vld [vmem:[%s978_s0 + $0x1e8] sm:$0xff]  ;;  %v30_v11 = vld [vmem:[%s978_s0 + $0x80] sm:$0xff] }
  0x1a   :  { %122 = vmatpush.msra.mxu0 %v81_v12  ;;  %528 = vmatpush.msra.mxu1 %v81_v12 }
  0x1b   :  { %529 = vmatpush.msra.mxu2 %v81_v12  ;;  %530 = vmatpush.msra.mxu3 %v81_v12 }
  0x1c   :  { %123 = vmatpush.msra.mxu0 %v80_v13  ;;  %531 = vmatpush.msra.mxu1 %v80_v13 }
  0x1d   :  { %532 = vmatpush.msra.mxu2 %v80_v13  ;;  %533 = vmatpush.msra.mxu3 %v80_v13  ;;  %v76_v13 = vld [vmem:[%s978_s0 + $0x1f0] sm:$0xff] }
  0x1e   :  { %124 = vmatpush.msra.mxu0 %v79_v14  ;;  %534 = vmatpush.msra.mxu1 %v79_v14 }
  0x1f   :  { %535 = vmatpush.msra.mxu2 %v79_v14  ;;  %536 = vmatpush.msra.mxu3 %v79_v14 }
  0x20   :  { %125 = vmatpush.msra.mxu0 %v78_v15  ;;  %537 = vmatpush.msra.mxu1 %v78_v15 }
  0x21   :  { %538 = vmatpush.msra.mxu2 %v78_v15  ;;  %126 = vmatmul.f32.vlgmr.msra.gmra.mxu0 %v14_v16  ;;  %v31_v16 = vld [vmem:[%s978_s0 + $0x88] sm:$0xff] }
  0x22   :  { %183 = vmatmul.f32.vlgmr.msra.gmra.mxu1 %v33_v17  ;;  %225 = vmatmul.f32.vlgmr.msra.gmra.mxu2 %v47_v18 }
  0x23   :  { %539 = vmatpush.msra.mxu3 %v78_v15 }
  0x24   :  { %264 = vmatmul.f32.vlgmr.msra.gmra.mxu3 %v60_v19  ;;  %v77_v19 = vld [vmem:[%s978_s0 + $0x1f8] sm:$0xff] }
  0x29   :  { %129 = vmatmul.f32.gmra.mxu0 %v15_v20  ;;  %v46_v20 = vld [vmem:[%s978_s0 + $0x100] sm:$0xff] }
  0x2a   :  { %186 = vmatmul.f32.gmra.mxu1 %v34_v21  ;;  %228 = vmatmul.f32.gmra.mxu2 %v48_v22 }
  0x2c   :  { %267 = vmatmul.f32.gmra.mxu3 %v61_v23  ;;  %v32_v23 = vld [vmem:[%s978_s0 + $0x90] sm:$0xff] }
  0x31   :  { %132 = vmatmul.f32.gmra.mxu0 %v16_v24 }
  0x32   :  { %189 = vmatmul.f32.gmra.mxu1 %v35_v25  ;;  %231 = vmatmul.f32.gmra.mxu2 %v49_v26 }
  0x34   :  { %270 = vmatmul.f32.gmra.mxu3 %v62_v27 }
  0x39   :  { %135 = vmatmul.f32.gmra.mxu0 %v17_v28 }
  0x3a   :  { %192 = vmatmul.f32.gmra.mxu1 %v36_v29  ;;  %234 = vmatmul.f32.gmra.mxu2 %v50_v30 }
  0x3c   :  { %273 = vmatmul.f32.gmra.mxu3 %v63_v31 }
  0x41   :  { %138 = vmatmul.f32.gmra.mxu0 %v18_v32 }
  0x42   :  { %195 = vmatmul.f32.gmra.mxu1 %v37_v33  ;;  %237 = vmatmul.f32.gmra.mxu2 %v51_v34 }
  0x44   :  { %276 = vmatmul.f32.gmra.mxu3 %v64_v35 }
  0x49   :  { %141 = vmatmul.f32.gmra.mxu0 %v19_v36 }
  0x4a   :  { %198 = vmatmul.f32.gmra.mxu1 %v38_v37  ;;  %240 = vmatmul.f32.gmra.mxu2 %v52_v38 }
  0x4c   :  { %279 = vmatmul.f32.gmra.mxu3 %v65_v39 }
  0x51   :  { %144 = vmatmul.f32.gmra.mxu0 %v20_v40 }
  0x52   :  { %201 = vmatmul.f32.gmra.mxu1 %v39_v41  ;;  %243 = vmatmul.f32.gmra.mxu2 %v53_v42 }
  0x54   :  { %282 = vmatmul.f32.gmra.mxu3 %v66_v43 }
  0x59   :  { %147 = vmatmul.f32.gmra.mxu0 %v21_v44 }
  0x5a   :  { %204 = vmatmul.f32.gmra.mxu1 %v40_v45  ;;  %246 = vmatmul.f32.gmra.mxu2 %v54_v46 }
  0x5c   :  { %285 = vmatmul.f32.gmra.mxu3 %v67_v47 }
  0x61   :  { %150 = vmatmul.f32.gmra.mxu0 %v22_v48 }
  0x62   :  { %207 = vmatmul.f32.gmra.mxu1 %v41_v49  ;;  %249 = vmatmul.f32.gmra.mxu2 %v55_v50 }
  0x64   :  { %288 = vmatmul.f32.gmra.mxu3 %v68_v51 }
  0x69   :  { %153 = vmatmul.f32.gmra.mxu0 %v23_v52 }
  0x6a   :  { %210 = vmatmul.f32.gmra.mxu1 %v42_v53  ;;  %252 = vmatmul.f32.gmra.mxu2 %v56_v54 }
  0x6c   :  { %291 = vmatmul.f32.gmra.mxu3 %v69_v55 }
  0x71   :  { %156 = vmatmul.f32.gmra.mxu0 %v24_v56 }
  0x72   :  { %213 = vmatmul.f32.gmra.mxu1 %v43_v57  ;;  %255 = vmatmul.f32.gmra.mxu2 %v57_v58 }
  0x74   :  { %294 = vmatmul.f32.gmra.mxu3 %v70_v59 }
  0x79   :  { %159 = vmatmul.f32.gmra.mxu0 %v25_v60 }
  0x7a   :  { %216 = vmatmul.f32.gmra.mxu1 %v44_v61  ;;  %258 = vmatmul.f32.gmra.mxu2 %v58_v62 }
  0x7c   :  { %297 = vmatmul.f32.gmra.mxu3 %v71_v63 }
  0x81   :  { %162 = vmatmul.f32.gmra.mxu0 %v26_v0 }
  0x82   :  { %219 = vmatmul.f32.gmra.mxu1 %v45_v1  ;;  %261 = vmatmul.f32.gmra.mxu2 %v59_v2 }
  0x84   :  { %300 = vmatmul.f32.gmra.mxu3 %v72_v3 }
  0x89   :  { %165 = vmatmul.f32.gmra.mxu0 %v27_v4 }
  0x8a   :  { %222 = vmatmul.f32.gmra.mxu1 %v46_v20 }
  0x8c   :  { %303 = vmatmul.f32.gmra.mxu3 %v73_v5 }
  0x91   :  { %168 = vmatmul.f32.gmra.mxu0 %v28_v6 }
  0x94   :  { %306 = vmatmul.f32.gmra.mxu3 %v74_v7 }
  0x99   :  { %171 = vmatmul.f32.gmra.mxu0 %v29_v8 }
  0x9c   :  { %309 = vmatmul.f32.gmra.mxu3 %v75_v9 }
  0x9e   :  { %v782_v10 = vpop.f32.mrf.mxu0 }
  0x9f   :  { %v787_v12 = vpop.f32.mrf.mxu1 }
  0xa1   :  { %174 = vmatmul.f32.gmra.mxu0 %v30_v11 }
  0xa4   :  { %312 = vmatmul.f32.gmra.mxu3 %v76_v13 }
  0xa5   :  { %v792_v14 = vpop.f32.mrf.mxu2 }
  0xa6   :  { %v794_v15 = vpop.f32.mrf.mxu0 }
  0xa7   :  { %v799_v17 = vpop.f32.mrf.mxu1  ;;  %v265_v18 = vpop.f32.mrf.mxu3 }
  0xa8   :  { %v365_v26 = vmax.f32 %v265_v18, 0.0 }
  0xa9   :  { %177 = vmatmul.f32.gmra.mxu0 %v31_v16 }
  0xac   :  { %315 = vmatmul.f32.gmra.mxu3 %v77_v19 }
  0xad   :  { %v807_v21 = vpop.f32.mrf.mxu2 }
  0xae   :  { %v809_v22 = vpop.f32.mrf.mxu0 }
  0xaf   :  { %v814_v24 = vpop.f32.mrf.mxu1  ;;  %v268_v25 = vpop.f32.mrf.mxu3 }
  0xb0   :  { %v366_v27 = vmax.f32 %v268_v25, 0.0 }
  0xb1   :  { %180 = vmatmul.f32.gmra.mxu0 %v32_v23 }
  0xb2   :  { %427 = vmatpush.msrb.mxu3 %v366_v27 }
  0xb4   :  { %428 = vmatpush.msrb.mxu3 %v365_v26 }
  0xb5   :  { %v816_v28 = vpop.f32.mrf.mxu2 }
  0xb6   :  { %v818_v29 = vpop.f32.mrf.mxu0 }
  0xb7   :  { %v820_v30 = vpop.f32.mrf.mxu1  ;;  %v822_v31 = vpop.f32.mrf.mxu3 }
  0xbd   :  { %v824_v32 = vpop.f32.mrf.mxu2 }
  0xbe   :  { %v826_v33 = vpop.f32.mrf.mxu0 }
  0xbf   :  { %v828_v34 = vpop.f32.mrf.mxu1  ;;  %v830_v35 = vpop.f32.mrf.mxu3 }
  0xc5   :  { %v832_v36 = vpop.f32.mrf.mxu2 }
  0xc6   :  { %v834_v37 = vpop.f32.mrf.mxu0 }
  0xc7   :  { %v199_v38 = vpop.f32.mrf.mxu1  ;;  %v836_v39 = vpop.f32.mrf.mxu3 }
  0xc8   :  { %v343_v27 = vmax.f32 %v199_v38, 0.0 }
  0xcd   :  { %v838_v40 = vpop.f32.mrf.mxu2 }
  0xce   :  { %v840_v41 = vpop.f32.mrf.mxu0  ;;  %v357_v38 = vmax.f32 %v838_v40, 0.0  ;;  %v354_v40 = vmax.f32 %v816_v28, 0.0 }
  0xcf   :  { %v202_v42 = vpop.f32.mrf.mxu1  ;;  %v842_v43 = vpop.f32.mrf.mxu3 }
  0xd0   :  { %v344_v25 = vmax.f32 %v202_v42, 0.0  ;;  %v340_v42 = vmax.f32 %v814_v24, 0.0 }
  0xd5   :  { %v844_v44 = vpop.f32.mrf.mxu2 }
  0xd6   :  { %v846_v45 = vpop.f32.mrf.mxu0 }
  0xd7   :  { %v205_v46 = vpop.f32.mrf.mxu1  ;;  %v848_v47 = vpop.f32.mrf.mxu3 }
  0xd8   :  { %v345_v20 = vmax.f32 %v205_v46, 0.0  ;;  %v341_v46 = vmax.f32 %v820_v30, 0.0  ;;  %v338_v30 = vmax.f32 %v787_v12, 0.0  ;;  %v352_v12 = vmax.f32 %v792_v14, 0.0 }
  0xdd   :  { %v247_v48 = vpop.f32.mrf.mxu2 }
  0xde   :  { %v850_v49 = vpop.f32.mrf.mxu0 }
  0xdf   :  { %v208_v50 = vpop.f32.mrf.mxu1  ;;  %v852_v51 = vpop.f32.mrf.mxu3 }
  0xe0   :  { %v346_v9 = vmax.f32 %v208_v50, 0.0 }
  0xe5   :  { %v250_v52 = vpop.f32.mrf.mxu2 }
  0xe6   :  { %v854_v53 = vpop.f32.mrf.mxu0  ;;  %v360_v26 = vmax.f32 %v250_v52, 0.0  ;;  %v339_v52 = vmax.f32 %v799_v17, 0.0 }
  0xe7   :  { %v211_v54 = vpop.f32.mrf.mxu1  ;;  %v856_v55 = vpop.f32.mrf.mxu3 }
  0xe8   :  { %v347_v7 = vmax.f32 %v211_v54, 0.0 }
  0xed   :  { %v253_v56 = vpop.f32.mrf.mxu2 }
  0xee   :  { %v858_v57 = vpop.f32.mrf.mxu0  ;;  %v361_v23 = vmax.f32 %v253_v56, 0.0  ;;  %v358_v56 = vmax.f32 %v844_v44, 0.0  ;;  %v355_v44 = vmax.f32 %v824_v32, 0.0 }
  0xef   :  { %v214_v58 = vpop.f32.mrf.mxu1  ;;  %v860_v59 = vpop.f32.mrf.mxu3  ;;  %v329_v28 = vmax.f32 %v858_v57, 0.0 }
  0xf0   :  { %v348_v6 = vmax.f32 %v214_v58, 0.0  ;;  %v342_v58 = vmax.f32 %v828_v34, 0.0 }
  0xf5   :  { %v256_v60 = vpop.f32.mrf.mxu2 }
  0xf6   :  { %v862_v61 = vpop.f32.mrf.mxu0  ;;  %v362_v19 = vmax.f32 %v256_v60, 0.0  ;;  %v356_v60 = vmax.f32 %v832_v36, 0.0  ;;  %v353_v36 = vmax.f32 %v807_v21, 0.0  ;;  %v327_v21 = vmax.f32 %v850_v49, 0.0  ;;  %v385_v49 = vld [vmem:[%s979_s2 + $0x10] sm:$0xff] }
  0xf7   :  { %v217_v62 = vpop.f32.mrf.mxu1  ;;  %v864_v63 = vpop.f32.mrf.mxu3 }
  0xf8   :  { %v349_v4 = vmax.f32 %v217_v62, 0.0  ;;  %v359_v62 = vmax.f32 %v247_v48, 0.0 }
  0xfd   :  { %v259_v0 = vpop.f32.mrf.mxu2 }
  0xfe   :  { %v866_v1 = vpop.f32.mrf.mxu0  ;;  %v363_v11 = vmax.f32 %v259_v0, 0.0 }
  0xff   :  { %v220_v2 = vpop.f32.mrf.mxu1  ;;  %v868_v3 = vpop.f32.mrf.mxu3 }
 0x100   :  { %v350_v5 = vmax.f32 %v220_v2, 0.0  ;;  %v331_v2 = vmax.f32 %v866_v1, 0.0 }
 0x102   :  { %407 = vmatpush.msrb.mxu2 %v350_v5 }
 0x104   :  { %408 = vmatpush.msrb.mxu2 %v349_v4  ;;  %v330_v4 = vmax.f32 %v862_v61, 0.0 }
 0x105   :  { %v262_v8 = vpop.f32.mrf.mxu2 }
 0x106   :  { %v364_v13 = vmax.f32 %v262_v8, 0.0  ;;  %409 = vmatpush.msrb.mxu2 %v348_v6  ;;  %v166_v16 = vpop.f32.mrf.mxu0  ;;  %v328_v6 = vmax.f32 %v854_v53, 0.0  ;;  %v325_v8 = vmax.f32 %v840_v41, 0.0 }
 0x107   :  { %v870_v18 = vpop.f32.mrf.mxu3  ;;  %v332_v17 = vmax.f32 %v166_v16, 0.0  ;;  %v223_v61 = vpop.f32.mrf.mxu1  ;;  %v321_v16 = vmax.f32 %v809_v22, 0.0  ;;  %v383_v22 = vld [vmem:[%s979_s2] sm:$0xff] }
 0x108   :  { %410 = vmatpush.msrb.mxu2 %v347_v7  ;;  %429 = vmatpush.msrb.mxu3 %v364_v13  ;;  %v326_v7 = vmax.f32 %v846_v45, 0.0  ;;  %v351_v57 = vmax.f32 %v223_v61, 0.0  ;;  %v322_v45 = vmax.f32 %v818_v29, 0.0  ;;  %v319_v29 = vmax.f32 %v782_v10, 0.0  ;;  %v107_v10 = vld [vmem:[%s977_s1 + $0xe8] sm:$0xff] }
 0x10a   :  { %411 = vmatpush.msrb.mxu2 %v346_v9  ;;  %430 = vmatpush.msrb.mxu3 %v363_v11  ;;  %v324_v9 = vmax.f32 %v834_v37, 0.0  ;;  %v323_v11 = vmax.f32 %v826_v33, 0.0  ;;  %v320_v33 = vmax.f32 %v794_v15, 0.0  ;;  %v109_v15 = vld [vmem:[%s977_s1 + $0xf8] sm:$0xff] }
 0x10c   :  { %412 = vmatpush.msrb.mxu2 %v345_v20  ;;  %431 = vmatpush.msrb.mxu3 %v362_v19  ;;  %v384_v20 = vld [vmem:[%s979_s2 + $0x8] sm:$0xff] }
 0x10e   :  { %413 = vmatpush.msrb.mxu2 %v344_v25  ;;  %432 = vmatpush.msrb.mxu3 %v361_v23  ;;  %v169_v50 = vpop.f32.mrf.mxu0  ;;  %v108_v25 = vld [vmem:[%s977_s1 + $0xf0] sm:$0xff] }
 0x10f   :  { %v872_v54 = vpop.f32.mrf.mxu3  ;;  %v333_v24 = vmax.f32 %v169_v50, 0.0  ;;  %v106_v50 = vld [vmem:[%s977_s1 + $0xe0] sm:$0xff] }
 0x110   :  { %414 = vmatpush.msrb.mxu2 %v343_v27  ;;  %433 = vmatpush.msrb.mxu3 %v360_v26 }
 0x112   :  { %415 = vmatpush.msrb.mxu2 %v342_v58  ;;  %434 = vmatpush.msrb.mxu3 %v359_v62  ;;  %v105_v62 = vld [vmem:[%s977_s1 + $0xd8] sm:$0xff] }
 0x114   :  { %416 = vmatpush.msrb.mxu2 %v341_v46  ;;  %435 = vmatpush.msrb.mxu3 %v358_v56  ;;  %v378_v46 = vmax.f32 %v872_v54, 0.0  ;;  %v104_v56 = vld [vmem:[%s977_s1 + $0xd0] sm:$0xff]  ;;  %v102_v54 = vld [vmem:[%s977_s1 + $0xc0] sm:$0xff] }
 0x116   :  { %417 = vmatpush.msrb.mxu2 %v340_v42  ;;  %436 = vmatpush.msrb.mxu3 %v357_v38  ;;  %v172_v34 = vpop.f32.mrf.mxu0  ;;  %v377_v42 = vmax.f32 %v870_v18, 0.0  ;;  %v103_v38 = vld [vmem:[%s977_s1 + $0xc8] sm:$0xff]  ;;  %v101_v18 = vld [vmem:[%s977_s1 + $0xb8] sm:$0xff] }
 0x117   :  { %v334_v48 = vmax.f32 %v172_v34, 0.0  ;;  %v881_v0 = vpop.f32.mrf.mxu3  ;;  %v374_v34 = vmax.f32 %v860_v59, 0.0  ;;  %v369_v59 = vmax.f32 %v836_v39, 0.0  ;;  %v98_v39 = vld [vmem:[%s977_s1 + $0xa0] sm:$0xff] }
 0x118   :  { %418 = vmatpush.msrb.mxu2 %v339_v52  ;;  %437 = vmatpush.msrb.mxu3 %v356_v60  ;;  %v379_v58 = vmax.f32 %v881_v0, 0.0  ;;  %v376_v52 = vmax.f32 %v868_v3, 0.0  ;;  %v375_v60 = vmax.f32 %v864_v63, 0.0  ;;  %v100_v3 = vld [vmem:[%s977_s1 + $0xb0] sm:$0xff]  ;;  %v372_v63 = vmax.f32 %v852_v51, 0.0  ;;  %v386_v51 = vld [vmem:[%s979_s2 + $0x18] sm:$0xff] }
 0x119   :  { %387 = vmatpush.msrb.mxu1 %v334_v48  ;;  %v373_v48 = vmax.f32 %v856_v55, 0.0  ;;  %v371_v0 = vmax.f32 %v848_v47, 0.0  ;;  %v367_v55 = vmax.f32 %v822_v31, 0.0  ;;  %v97_v31 = vld [vmem:[%s977_s1 + $0x98] sm:$0xff]  ;;  %v95_v47 = vld [vmem:[%s977_s1 + $0x88] sm:$0xff] }
 0x11a   :  { %419 = vmatpush.msrb.mxu2 %v338_v30  ;;  %438 = vmatpush.msrb.mxu3 %v355_v44  ;;  %v370_v30 = vmax.f32 %v842_v43, 0.0  ;;  %v368_v44 = vmax.f32 %v830_v35, 0.0  ;;  %v99_v43 = vld [vmem:[%s977_s1 + $0xa8] sm:$0xff]  ;;  %v96_v35 = vld [vmem:[%s977_s1 + $0x90] sm:$0xff] }
 0x11b   :  { %388 = vmatpush.msrb.mxu1 %v333_v24  ;;  %v94_v24 = vld [vmem:[%s977_s1 + $0x80] sm:$0xff] }
 0x11c   :  { %439 = vmatpush.msrb.mxu3 %v354_v40 }
 0x11d   :  { %389 = vmatpush.msrb.mxu1 %v332_v17 }
 0x11e   :  { %440 = vmatpush.msrb.mxu3 %v353_v36  ;;  %v175_v32 = vpop.f32.mrf.mxu0 }
 0x11f   :  { %390 = vmatpush.msrb.mxu1 %v331_v2  ;;  %v310_v5 = vpop.f32.mrf.mxu3  ;;  %v335_v19 = vmax.f32 %v175_v32, 0.0 }
 0x120   :  { %441 = vmatpush.msrb.mxu3 %v352_v12  ;;  %v380_v27 = vmax.f32 %v310_v5, 0.0 }
 0x121   :  { %391 = vmatpush.msrb.mxu1 %v330_v4 }
 0x122   :  { %442 = vmatpush.msrb.mxu3 %v351_v57 }
 0x123   :  { %392 = vmatpush.msrb.mxu1 %v329_v28  ;;  %443 = vmatmul.f32.vlgmr.msrb.gmra.mxu3 %v385_v49 }
 0x125   :  { %393 = vmatpush.msrb.mxu1 %v328_v6 }
 0x126   :  { %v178_v1 = vpop.f32.mrf.mxu0 }
 0x127   :  { %394 = vmatpush.msrb.mxu1 %v327_v21  ;;  %v313_v14 = vpop.f32.mrf.mxu3  ;;  %v336_v41 = vmax.f32 %v178_v1, 0.0 }
 0x128   :  { %v381_v26 = vmax.f32 %v313_v14, 0.0 }
 0x129   :  { %395 = vmatpush.msrb.mxu1 %v326_v7 }
 0x12b   :  { %396 = vmatpush.msrb.mxu1 %v325_v8 }
 0x12d   :  { %397 = vmatpush.msrb.mxu1 %v324_v9 }
 0x12e   :  { %v181_v53 = vpop.f32.mrf.mxu0 }
 0x12f   :  { %398 = vmatpush.msrb.mxu1 %v323_v11  ;;  %v337_v13 = vmax.f32 %v181_v53, 0.0  ;;  %v316_v37 = vpop.f32.mrf.mxu3 }
 0x130   :  { %v382_v23 = vmax.f32 %v316_v37, 0.0 }
 0x131   :  { %399 = vmatpush.msrb.mxu1 %v322_v45  ;;  %420 = vmatpush.msrb.mxu2 %v337_v13 }
 0x133   :  { %400 = vmatpush.msrb.mxu1 %v321_v16  ;;  %421 = vmatpush.msrb.mxu2 %v336_v41 }
 0x135   :  { %401 = vmatpush.msrb.mxu1 %v320_v33  ;;  %422 = vmatpush.msrb.mxu2 %v335_v19 }
 0x136   :  { %423 = vmatmul.f32.vlgmr.msrb.gmra.mxu2 %v384_v20 }
 0x137   :  { %402 = vmatpush.msrb.mxu1 %v319_v29  ;;  %467 = vmatpush.msra.mxu2 %v109_v15 }
 0x138   :  { %403 = vmatmul.f32.vlgmr.msrb.gmra.mxu1 %v383_v22 }
 0x139   :  { %447 = vmatpush.msra.mxu1 %v382_v23  ;;  %468 = vmatpush.msra.mxu2 %v108_v25 }
 0x13b   :  { %448 = vmatpush.msra.mxu1 %v381_v26  ;;  %469 = vmatpush.msra.mxu2 %v107_v10 }
 0x13d   :  { %449 = vmatpush.msra.mxu1 %v380_v27  ;;  %470 = vmatpush.msra.mxu2 %v106_v50 }
 0x13f   :  { %450 = vmatpush.msra.mxu1 %v379_v58  ;;  %471 = vmatpush.msra.mxu2 %v105_v62 }
 0x141   :  { %451 = vmatpush.msra.mxu1 %v378_v46  ;;  %472 = vmatpush.msra.mxu2 %v104_v56 }
 0x143   :  { %452 = vmatpush.msra.mxu1 %v377_v42  ;;  %473 = vmatpush.msra.mxu2 %v103_v38 }
 0x145   :  { %453 = vmatpush.msra.mxu1 %v376_v52  ;;  %474 = vmatpush.msra.mxu2 %v102_v54 }
 0x147   :  { %454 = vmatpush.msra.mxu1 %v375_v60  ;;  %475 = vmatpush.msra.mxu2 %v101_v18 }
 0x149   :  { %455 = vmatpush.msra.mxu1 %v374_v34  ;;  %476 = vmatpush.msra.mxu2 %v100_v3 }
 0x14b   :  { %456 = vmatpush.msra.mxu1 %v373_v48  ;;  %477 = vmatpush.msra.mxu2 %v99_v43 }
 0x14d   :  { %457 = vmatpush.msra.mxu1 %v372_v63  ;;  %478 = vmatpush.msra.mxu2 %v98_v39 }
 0x14f   :  { %458 = vmatpush.msra.mxu1 %v371_v0  ;;  %479 = vmatpush.msra.mxu2 %v97_v31 }
 0x151   :  { %459 = vmatpush.msra.mxu1 %v370_v30  ;;  %480 = vmatpush.msra.mxu2 %v96_v35 }
 0x153   :  { %460 = vmatpush.msra.mxu1 %v369_v59  ;;  %481 = vmatpush.msra.mxu2 %v95_v47 }
 0x155   :  { %461 = vmatpush.msra.mxu1 %v368_v44  ;;  %482 = vmatpush.msra.mxu2 %v94_v24 }
 0x157   :  { %462 = vmatpush.msra.mxu1 %v367_v55 }
 0x158   :  { %463 = vmatmul.f32.vlgmr.msra.gmra.mxu1 %v386_v51 }
 0x1a6   :  { %v444_v2 = vpop.f32.mrf.mxu3 }
 0x1b5   :  { %v404_v40 = vpop.f32.mrf.mxu1 }
 0x1b9   :  { %v424_v17 = vpop.f32.mrf.mxu2 }
 0x1ba   :  { %v425_v36 = vadd.f32 %v424_v17, %v404_v40 }
 0x1bc   :  { %v445_v12 = vadd.f32 %v444_v2, %v425_v36 }
 0x1d5   :  { %v464_v32 = vpop.f32.mrf.mxu1 }
 0x1d6   :  { %v465_v4 = vadd.f32 %v464_v32, %v445_v12 }
 0x1d8   :  { %483 = vmatmul.f32.vlgmr.msra.gmra.mxu2 %v465_v4 }
 0x25b   :  { %v484_v5 = vpop.f32.mrf.mxu2 }
 0x25c   :  { %487 = vst [vmem:[%s980_s3] sm:$0xff] %v484_v5 }

</bundles_post_ra>
